<compile_context>
chip_gen: v5e
topology: v5e:2x2
jax: 0.10.0
libtpu: 0.0.40
codegen_flags: <defaults>
</compile_context>

<pallas_src>
import jax
import jax.numpy as jnp
from jax.experimental import pallas as pl
from jax.experimental.pallas import tpu as pltpu


D_IN, D_HID, D_OUT = 784, 256, 10
D_OUT_P = 128  # logits padded 10 -> 128 lanes for lane-dense stores / full MXU columns


def mlp_kernel(x_ref, w1_ref, b1_ref, w2_ref, b2_ref, o_ref):
    # x arrives as f32 straight from HBM (no wrapper copy); cast to bf16 on the
    # VPU right before the MXU so layer 1 runs in the native bf16 MXU format.
    x = x_ref[...].astype(jnp.bfloat16)
    h = jnp.dot(x, w1_ref[...], preferred_element_type=jnp.float32)   # [TB, 256] f32 acc
    h = jnp.maximum(h + b1_ref[...], 0.0)                             # bias + ReLU in f32
    # Layer 2 stays f32 (w2 is tiny and resident); no bf16 rounding of h.
    out = jnp.dot(h, w2_ref[...], preferred_element_type=jnp.float32)  # [TB, 128]
    o_ref[...] = (out + b2_ref[...]).astype(o_ref.dtype)


def _round_up(x, m):
    return ((x + m - 1) // m) * m


def pack_params(w1, b1, w2, b2):
    """One-time (model-load) packing of parameters for the kernel.

    w1: [784, 256], b1: [256] or [1, 256], w2: [256, 10], b2: [10] or [1, 10]
    (weights stored [in, out], i.e. transposed vs. PyTorch's [out, in]).
    """
    assert w1.shape == (D_IN, D_HID), w1.shape
    assert w2.shape == (D_HID, D_OUT), w2.shape
    w1p = w1.astype(jnp.bfloat16)                                   # [784, 256] bf16
    b1p = jnp.reshape(b1, (1, D_HID)).astype(jnp.float32)           # [1, 256]  f32
    w2p = jnp.zeros((D_HID, D_OUT_P), jnp.float32)
    w2p = w2p.at[:, :D_OUT].set(w2.astype(jnp.float32))             # [256, 128] f32
    b2p = jnp.zeros((1, D_OUT_P), jnp.float32)
    b2p = b2p.at[:, :D_OUT].set(jnp.reshape(b2, (1, D_OUT)).astype(jnp.float32))
    return w1p, b1p, w2p, b2p


def linear_classifier(x, packed_params, *, tb_max=1024):
    """x: [B, 784] float32; packed_params from pack_params().
    Returns logits [B, 10] float32."""
    w1p, b1p, w2p, b2p = packed_params
    B, d_in = x.shape
    assert d_in == D_IN, x.shape

    # ---- batch tiling: minimize padding, >=2 tiles when possible (v7x 2 TCs) ----
    B8 = _round_up(B, 8)
    n_tiles = max(2, pl.cdiv(B8, tb_max))          # at least 2 grid points if useful
    TB = _round_up(pl.cdiv(B8, n_tiles), 8)        # tile rows, multiple of 8
    n_tiles = pl.cdiv(B8, TB)                      # drop tiles that would be all padding
    B_p = n_tiles * TB                             # padded rows handled by Pallas OOB masking

    flops = 2 * B_p * D_IN * D_HID + 2 * B_p * D_HID * D_OUT_P
    bytes_accessed = (B * D_IN * 4 + w1p.size * 2 + b1p.size * 4
                      + w2p.size * 4 + b2p.size * 4 + B_p * D_OUT_P * 4)

    out = pl.pallas_call(
        mlp_kernel,
        out_shape=jax.ShapeDtypeStruct((B_p, D_OUT_P), jnp.float32),
        grid=(n_tiles,),
        in_specs=[
            # batch-tiled activations, read directly from the caller's f32 x
            pl.BlockSpec((TB, D_IN), lambda i: (i, 0)),
            # weights / biases: constant index_map -> resident in VMEM across tiles
            pl.BlockSpec((D_IN, D_HID), lambda i: (0, 0)),
            pl.BlockSpec((1, D_HID), lambda i: (0, 0)),
            pl.BlockSpec((D_HID, D_OUT_P), lambda i: (0, 0)),
            pl.BlockSpec((1, D_OUT_P), lambda i: (0, 0)),
        ],
        out_specs=pl.BlockSpec((TB, D_OUT_P), lambda i: (i, 0)),
        compiler_params=pltpu.CompilerParams(
            dimension_semantics=("parallel",),
        ),
        cost_estimate=pl.CostEstimate(
            flops=flops, transcendentals=0, bytes_accessed=bytes_accessed),
    )(x, w1p, b1p, w2p, b2p)

    return out[:B, :D_OUT]


def init_params(key):
    """Deterministic init matching nn.Linear's U(-1/sqrt(fan_in), 1/sqrt(fan_in))."""
    k1, k2, k3, k4 = jax.random.split(key, 4)
    lim1 = 1.0 / jnp.sqrt(784.0)
    lim2 = 1.0 / jnp.sqrt(256.0)
    # Stored as [in, out] (transposed vs. PyTorch's [out, in]) for x @ W.
    w1 = jax.random.uniform(k1, (784, 256), jnp.float32, -lim1, lim1)
    b1 = jax.random.uniform(k2, (1, 256), jnp.float32, -lim1, lim1)
    w2 = jax.random.uniform(k3, (256, 10), jnp.float32, -lim2, lim2)
    b2 = jax.random.uniform(k4, (1, 10), jnp.float32, -lim2, lim2)
    return w1, b1, w2, b2


if __name__ == "__main__":
    key = jax.random.PRNGKey(0)
    kx, kp = jax.random.split(key)

    B = 8  # small batch just for the correctness check
    x = jax.random.normal(kx, (B, 784), jnp.float32)
    w1, b1, w2, b2 = init_params(kp)

    packed = pack_params(w1, b1, w2, b2)     # one-time packing (model-load path)
    logits = linear_classifier(x, packed)
    logits = jax.block_until_ready(logits)
    assert logits.shape == (B, 10)

    # Reference in plain JAX, replicating the kernel's bf16 rounding of the
    # first matmul's inputs (accumulation / bias / ReLU / layer 2 are all f32).
    xb = x.astype(jnp.bfloat16).astype(jnp.float32)
    w1b = w1.astype(jnp.bfloat16).astype(jnp.float32)
    h = jnp.maximum(xb @ w1b + b1, 0.0)
    ref = h @ w2 + b2
    assert jnp.allclose(logits, ref, atol=2e-3, rtol=2e-3), (
        float(jnp.max(jnp.abs(logits - ref))))

    print("KERNEL_OK")
</pallas_src>

<mosaic_0001>
module attributes {stable_mosaic.version = 11 : i64} {
  func.func @mlp_kernel(%arg0: i32, %arg1: memref<8x784xf32, #tpu.memory_space<vmem>>, %arg2: memref<784x256xbf16, #tpu.memory_space<vmem>>, %arg3: memref<1x256xf32, #tpu.memory_space<vmem>>, %arg4: memref<256x128xf32, #tpu.memory_space<vmem>>, %arg5: memref<1x128xf32, #tpu.memory_space<vmem>>, %arg6: memref<8x128xf32, #tpu.memory_space<vmem>>) attributes {dimension_semantics = [#tpu.dimension_semantics<parallel>], iteration_bounds = array<i64: 1>, scalar_prefetch = 0 : i64, scratch_operands = 0 : i64, tpu.core_type = #tpu.core_type<tc>, window_params = [{transform_indices = @transform_0, window_bounds = array<i64: 8, 784>}, {pipeline_mode = #tpu.pipeline_mode<synchronous>, transform_indices = @transform_1, window_bounds = array<i64: 784, 256>}, {pipeline_mode = #tpu.pipeline_mode<synchronous>, transform_indices = @transform_2, window_bounds = array<i64: 1, 256>}, {pipeline_mode = #tpu.pipeline_mode<synchronous>, transform_indices = @transform_3, window_bounds = array<i64: 256, 128>}, {pipeline_mode = #tpu.pipeline_mode<synchronous>, transform_indices = @transform_4, window_bounds = array<i64: 1, 128>}, {transform_indices = @transform_5, window_bounds = array<i64: 8, 128>}]} {
    %c0 = arith.constant 0 : index
    %c0_0 = arith.constant 0 : index
    %0 = vector.load %arg1[%c0, %c0_0] : memref<8x784xf32, #tpu.memory_space<vmem>>, vector<8x784xf32>
    %1 = arith.truncf %0 : vector<8x784xf32> to vector<8x784xbf16>
    %c0_1 = arith.constant 0 : index
    %c0_2 = arith.constant 0 : index
    %2 = vector.load %arg2[%c0_1, %c0_2] : memref<784x256xbf16, #tpu.memory_space<vmem>>, vector<784x256xbf16>
    %cst = arith.constant dense<0.000000e+00> : vector<8x256xf32>
    %3 = tpu.matmul %1, %2, %cst {dimension_numbers = #tpu.dot_dimension_numbers<[1], [0], [0], [1], [0, 0, 1, 1], [], []>} : vector<8x784xbf16>, vector<784x256xbf16>, vector<8x256xf32> -> vector<8x256xf32>
    %c0_3 = arith.constant 0 : index
    %c0_4 = arith.constant 0 : index
    %4 = vector.load %arg3[%c0_3, %c0_4] : memref<1x256xf32, #tpu.memory_space<vmem>>, vector<1x256xf32>
    %5 = vector.broadcast %4 : vector<1x256xf32> to vector<8x256xf32>
    %6 = arith.addf %3, %5 : vector<8x256xf32>
    %cst_5 = arith.constant 0.000000e+00 : f32
    %7 = vector.broadcast %cst_5 : f32 to vector<8x256xf32>
    %8 = arith.maximumf %6, %7 : vector<8x256xf32>
    %c0_6 = arith.constant 0 : index
    %c0_7 = arith.constant 0 : index
    %9 = vector.load %arg4[%c0_6, %c0_7] : memref<256x128xf32, #tpu.memory_space<vmem>>, vector<256x128xf32>
    %cst_8 = arith.constant dense<0.000000e+00> : vector<8x128xf32>
    %10 = tpu.matmul %8, %9, %cst_8 {dimension_numbers = #tpu.dot_dimension_numbers<[1], [0], [0], [1], [0, 0, 1, 1], [], []>} : vector<8x256xf32>, vector<256x128xf32>, vector<8x128xf32> -> vector<8x128xf32>
    %c0_9 = arith.constant 0 : index
    %c0_10 = arith.constant 0 : index
    %11 = vector.load %arg5[%c0_9, %c0_10] : memref<1x128xf32, #tpu.memory_space<vmem>>, vector<1x128xf32>
    %12 = vector.broadcast %11 : vector<1x128xf32> to vector<8x128xf32>
    %13 = arith.addf %10, %12 : vector<8x128xf32>
    %c0_11 = arith.constant 0 : index
    %c0_12 = arith.constant 0 : index
    %14 = vector.load %arg6[%c0_11, %c0_12] : memref<8x128xf32, #tpu.memory_space<vmem>>, vector<8x128xf32>
    tpu.vector_store %arg6[%c0_11, %c0_12], %13 {strides = array<i32>} : memref<8x128xf32, #tpu.memory_space<vmem>>, vector<8x128xf32>,
    return
  }
  func.func @transform_0(%arg0: i32) -> (i32, i32) {
    %c0_i32 = arith.constant 0 : i32
    %c0_i32_0 = arith.constant 0 : i32
    return %arg0, %c0_i32 : i32, i32
  }
  func.func @transform_1(%arg0: i32) -> (i32, i32) {
    %c0_i32 = arith.constant 0 : i32
    %c0_i32_0 = arith.constant 0 : i32
    %c0_i32_1 = arith.constant 0 : i32
    return %c0_i32, %c0_i32_0 : i32, i32
  }
  func.func @transform_2(%arg0: i32) -> (i32, i32) {
    %c0_i32 = arith.constant 0 : i32
    %c0_i32_0 = arith.constant 0 : i32
    %c0_i32_1 = arith.constant 0 : i32
    return %c0_i32, %c0_i32_0 : i32, i32
  }
  func.func @transform_3(%arg0: i32) -> (i32, i32) {
    %c0_i32 = arith.constant 0 : i32
    %c0_i32_0 = arith.constant 0 : i32
    %c0_i32_1 = arith.constant 0 : i32
    return %c0_i32, %c0_i32_0 : i32, i32
  }
  func.func @transform_4(%arg0: i32) -> (i32, i32) {
    %c0_i32 = arith.constant 0 : i32
    %c0_i32_0 = arith.constant 0 : i32
    %c0_i32_1 = arith.constant 0 : i32
    return %c0_i32, %c0_i32_0 : i32, i32
  }
  func.func @transform_5(%arg0: i32) -> (i32, i32) {
    %c0_i32 = arith.constant 0 : i32
    %c0_i32_0 = arith.constant 0 : i32
    return %arg0, %c0_i32 : i32, i32
  }
}

</mosaic_0001>

<bundles_post_ra>
// kernel: tpu_custom_call.1
= control target key start
LH: loop header
LB: loop body
LE: loop exit
PB: predicated region body
PF: predicated region fallthrough
CT: control target
= control target key end

     0   :  { %10 = vsyncpa [#allocation3], 0  ;;  %s1686_s0 = inlined_call_operand.hbm [shape: f32[8,784], index: 0, kind: input, shape index: {}]   ;;  %s1687_s1 = inlined_call_operand.hbm [shape: bf16[784,256], index: 1, kind: input, shape index: {}]   ;;  %s1688_s2 = inlined_call_operand.hbm [shape: f32[1,256], index: 2, kind: input, shape index: {}]   ;;  %s1689_s3 = inlined_call_operand.hbm [shape: f32[256,128], index: 3, kind: input, shape index: {}]   ;;  %s1690_s4 = inlined_call_operand.vmem [shape: f32[1,128], index: 4, kind: input, shape index: {}]   ;;  %s1691_s5 = inlined_call_operand.hbm [shape: f32[8,128], index: 5, kind: output, shape index: {}]  }
   0x1   :  { %11 = vsyncpa [#allocation6], 0 }
   0x2   :  { %12 = vsyncpa [#allocation9], 0  ;;  %s29_s20 = sshll.u32 %s1687_s1, 4  ;;  %s30_s20 = int_to_ptr.hbm [resolvable:$true] %s29_s20 }
   0x3   :  { %13 = vsyncpa [#allocation4], 0  ;;  %s1601_s21 = smov [#allocation5]   ;;  %s19_s25 = sshll.u32 %s1686_s0, 4  ;;  %s20_s25 = int_to_ptr.hbm [resolvable:$true] %s19_s25 }
   0x4   :  { %s31_s22 = sshll.u32 %s1601_s21, 4  ;;  %s1602_s26 = smov 128   ;;  %s32_s22 = int_to_ptr.vmem [resolvable:$true] %s31_s22 }
   0x5   :  { %s1603_s27 = smov 8   ;;  %s1604_s28 = smov [#allocation2]  }
   0x6   :  { %37 = dma.hbm_to_vmem [thread:$0]  %s30_s20, 12544, %s32_s22, [#allocation6], %s1602_s26, %s1602_s26, %s1603_s27  }
   0x7   :  { %s21_s29 = sshll.u32 %s1604_s28, 4  ;;  %s43_s7 = sshll.u32 %s1688_s2, 4  ;;  %s22_s29 = int_to_ptr.vmem [resolvable:$true] %s21_s29  ;;  %s44_s7 = int_to_ptr.hbm [resolvable:$true] %s43_s7 }
   0x8   :  { %24 = dma.hbm_to_vmem [thread:$0]  %s20_s25, 896, %s22_s29, [#allocation3]  }
   0x9   :  { %s53_s9 = sshll.u32 %s1689_s3, 4  ;;  %s1605_s10 = smov [#allocation7]   ;;  %s54_s9 = int_to_ptr.hbm [resolvable:$true] %s53_s9 }
   0xa   :  { %s45_s11 = sshll.u32 %s1605_s10, 4  ;;  %s1606_s0 = smov [#allocation8]   ;;  %s46_s11 = int_to_ptr.vmem [resolvable:$true] %s45_s11 }
   0xb   :  { %48 = dma.hbm_to_vmem [thread:$0]  %s44_s7, 32, %s46_s11, [#allocation6]  }
   0xc   :  { %s55_s12 = sshll.u32 %s1606_s0, 4  ;;  %s56_s12 = int_to_ptr.vmem [resolvable:$true] %s55_s12 }
   0xd   :  { %61 = dma.hbm_to_vmem [thread:$0]  %s54_s9, 4096, %s56_s12, [#allocation9], %s1602_s26, %s1602_s26, %s1603_s27  }
   0xe   :  { %1593 = dma.done.wait [#allocation3], 896  }
   0xf   :  { %1594 = vsyncadd [#allocation3], 4294966400 }
  0x10   :  { %1595 = dma.done.wait [#allocation6], 12576  }
  0x11   :  { %1596 = vsyncadd [#allocation6], 4294954720 }
  0x12   :  { %1597 = dma.done.wait [#allocation9], 4096  }
  0x13   :  { %1598 = vsyncadd [#allocation9], 4294963200  ;;  %v1031_v0 = vld [vmem:[#allocation5 + $0x70] sm:$0xf]  ;;  %v1382_v1 = vld [vmem:[#allocation5 + $0x74] sm:$0xf0] }
  0x14   :  { %v1159_v2 = vld [vmem:[#allocation5 + $0x170] sm:$0xf]  ;;  %v1032_v3 = vor.u32 %v1382_v1, %v1031_v0  ;;  %v1414_v4 = vld [vmem:[#allocation5 + $0x174] sm:$0xf0]  ;;  %v1023_v11 = vld [vmem:[#allocation5 + $0x60] sm:$0xf] }
  0x15   :  { %v1223_v5 = vld [vmem:[#allocation5 + $0x1f0] sm:$0xf]  ;;  %v1430_v6 = vld [vmem:[#allocation5 + $0x1f4] sm:$0xf0]  ;;  %v1160_v7 = vor.u32 %v1414_v4, %v1159_v2  ;;  %v1380_v13 = vld [vmem:[#allocation5 + $0x64] sm:$0xf0] }
  0x16   :  { %v1224_v8 = vor.u32 %v1430_v6, %v1223_v5  ;;  %v1095_v9 = vld [vmem:[#allocation5 + $0xf0] sm:$0xf]  ;;  %v1398_v10 = vld [vmem:[#allocation5 + $0xf4] sm:$0xf0]  ;;  %693 = vmatpush.bf16.msra.mxu0 %v1032_v3  ;;  %v1151_v14 = vld [vmem:[#allocation5 + $0x160] sm:$0xf]  ;;  %v1024_v16 = vor.u32 %v1380_v13, %v1023_v11 }
  0x17   :  { %v1096_v12 = vor.u32 %v1398_v10, %v1095_v9  ;;  %v1412_v15 = vld [vmem:[#allocation5 + $0x164] sm:$0xf0]  ;;  %719 = vmatpush.bf16.msra.mxu2 %v1160_v7  ;;  %v1215_v18 = vld [vmem:[#allocation5 + $0x1e0] sm:$0xf]  ;;  %v1015_v23 = vld [vmem:[#allocation5 + $0x50] sm:$0xf] }
  0x18   :  { %732 = vmatpush.bf16.msra.mxu3 %v1224_v8  ;;  %v1152_v17 = vor.u32 %v1412_v15, %v1151_v14  ;;  %v1428_v19 = vld [vmem:[#allocation5 + $0x1e4] sm:$0xf0]  ;;  %v1087_v20 = vld [vmem:[#allocation5 + $0xe0] sm:$0xf]  ;;  %v1378_v24 = vld [vmem:[#allocation5 + $0x54] sm:$0xf0] }
  0x19   :  { %706 = vmatpush.bf16.msra.mxu1 %v1096_v12  ;;  %v1216_v21 = vor.u32 %v1428_v19, %v1215_v18  ;;  %v1396_v22 = vld [vmem:[#allocation5 + $0xe4] sm:$0xf0]  ;;  %v1143_v26 = vld [vmem:[#allocation5 + $0x150] sm:$0xf]  ;;  %v1410_v27 = vld [vmem:[#allocation5 + $0x154] sm:$0xf0]  ;;  %v1016_v29 = vor.u32 %v1378_v24, %v1015_v23 }
  0x1a   :  { %v1088_v25 = vor.u32 %v1396_v22, %v1087_v20  ;;  %v1207_v28 = vld [vmem:[#allocation5 + $0x1d0] sm:$0xf]  ;;  %694 = vmatpush.bf16.msra.mxu0 %v1024_v16  ;;  %v1426_v30 = vld [vmem:[#allocation5 + $0x1d4] sm:$0xf0]  ;;  %v1144_v33 = vor.u32 %v1410_v27, %v1143_v26  ;;  %v1007_v35 = vld [vmem:[#allocation5 + $0x40] sm:$0xf] }
  0x1b   :  { %v1079_v31 = vld [vmem:[#allocation5 + $0xd0] sm:$0xf]  ;;  %v1394_v32 = vld [vmem:[#allocation5 + $0xd4] sm:$0xf0]  ;;  %720 = vmatpush.bf16.msra.mxu2 %v1152_v17  ;;  %v1208_v34 = vor.u32 %v1426_v30, %v1207_v28  ;;  %v1376_v36 = vld [vmem:[#allocation5 + $0x44] sm:$0xf0] }
  0x1c   :  { %733 = vmatpush.bf16.msra.mxu3 %v1216_v21  ;;  %v1135_v37 = vld [vmem:[#allocation5 + $0x140] sm:$0xf]  ;;  %v1080_v38 = vor.u32 %v1394_v32, %v1079_v31  ;;  %v1408_v39 = vld [vmem:[#allocation5 + $0x144] sm:$0xf0]  ;;  %v1008_v44 = vor.u32 %v1376_v36, %v1007_v35  ;;  %v999_v47 = vld [vmem:[#allocation5 + $0x30] sm:$0xf] }
  0x1d   :  { %707 = vmatpush.bf16.msra.mxu1 %v1088_v25  ;;  %v1199_v40 = vld [vmem:[#allocation5 + $0x1c0] sm:$0xf]  ;;  %v1424_v41 = vld [vmem:[#allocation5 + $0x1c4] sm:$0xf0]  ;;  %v1136_v45 = vor.u32 %v1408_v39, %v1135_v37  ;;  %v1374_v48 = vld [vmem:[#allocation5 + $0x34] sm:$0xf0] }
  0x1e   :  { %v1071_v42 = vld [vmem:[#allocation5 + $0xc0] sm:$0xf]  ;;  %v1392_v43 = vld [vmem:[#allocation5 + $0xc4] sm:$0xf0]  ;;  %695 = vmatpush.bf16.msra.mxu0 %v1016_v29  ;;  %v1200_v46 = vor.u32 %v1424_v41, %v1199_v40  ;;  %v1127_v49 = vld [vmem:[#allocation5 + $0x130] sm:$0xf]  ;;  %v1000_v56 = vor.u32 %v1374_v48, %v999_v47 }
  0x1f   :  { %721 = vmatpush.bf16.msra.mxu2 %v1144_v33  ;;  %v1072_v50 = vor.u32 %v1392_v43, %v1071_v42  ;;  %v1406_v51 = vld [vmem:[#allocation5 + $0x134] sm:$0xf0]  ;;  %v1191_v52 = vld [vmem:[#allocation5 + $0x1b0] sm:$0xf]  ;;  %v991_v59 = vld [vmem:[#allocation5 + $0x20] sm:$0xf] }
  0x20   :  { %734 = vmatpush.bf16.msra.mxu3 %v1208_v34  ;;  %v1422_v53 = vld [vmem:[#allocation5 + $0x1b4] sm:$0xf0]  ;;  %v1063_v54 = vld [vmem:[#allocation5 + $0xb0] sm:$0xf]  ;;  %v1128_v57 = vor.u32 %v1406_v51, %v1127_v49  ;;  %v1372_v60 = vld [vmem:[#allocation5 + $0x24] sm:$0xf0] }
  0x21   :  { %708 = vmatpush.bf16.msra.mxu1 %v1080_v38  ;;  %v1390_v55 = vld [vmem:[#allocation5 + $0xb4] sm:$0xf0]  ;;  %v1192_v58 = vor.u32 %v1422_v53, %v1191_v52  ;;  %v1119_v61 = vld [vmem:[#allocation5 + $0x120] sm:$0xf]  ;;  %v1404_v63 = vld [vmem:[#allocation5 + $0x124] sm:$0xf0]  ;;  %v992_v4 = vor.u32 %v1372_v60, %v991_v59 }
  0x22   :  { %696 = vmatpush.bf16.msra.mxu0 %v1008_v44  ;;  %v1064_v62 = vor.u32 %v1390_v55, %v1063_v54  ;;  %v1183_v0 = vld [vmem:[#allocation5 + $0x1a0] sm:$0xf]  ;;  %v1420_v1 = vld [vmem:[#allocation5 + $0x1a4] sm:$0xf0]  ;;  %v1120_v5 = vor.u32 %v1404_v63, %v1119_v61  ;;  %v983_v7 = vld [vmem:[#allocation5 + $0x10] sm:$0xf] }
  0x23   :  { %722 = vmatpush.bf16.msra.mxu2 %v1136_v45  ;;  %v1055_v2 = vld [vmem:[#allocation5 + $0xa0] sm:$0xf]  ;;  %v1388_v3 = vld [vmem:[#allocation5 + $0xa4] sm:$0xf0]  ;;  %v1184_v6 = vor.u32 %v1420_v1, %v1183_v0  ;;  %v1370_v8 = vld [vmem:[#allocation5 + $0x14] sm:$0xf0] }
  0x24   :  { %735 = vmatpush.bf16.msra.mxu3 %v1200_v46  ;;  %v1111_v9 = vld [vmem:[#allocation5 + $0x110] sm:$0xf]  ;;  %v1056_v10 = vor.u32 %v1388_v3, %v1055_v2  ;;  %v1402_v11 = vld [vmem:[#allocation5 + $0x114] sm:$0xf0]  ;;  %v984_v16 = vor.u32 %v1370_v8, %v983_v7  ;;  %v975_v17 = vld [vmem:[#allocation5] sm:$0xf] }
  0x25   :  { %709 = vmatpush.bf16.msra.mxu1 %v1072_v50  ;;  %v1175_v12 = vld [vmem:[#allocation5 + $0x190] sm:$0xf]  ;;  %v1418_v13 = vld [vmem:[#allocation5 + $0x194] sm:$0xf0]  ;;  %v1368_v18 = vld [vmem:[#allocation5 + $0x4] sm:$0xf0]  ;;  %v1112_v20 = vor.u32 %v1402_v11, %v1111_v9 }
  0x26   :  { %697 = vmatpush.bf16.msra.mxu0 %v1000_v56  ;;  %v1047_v14 = vld [vmem:[#allocation5 + $0x90] sm:$0xf]  ;;  %v1386_v15 = vld [vmem:[#allocation5 + $0x94] sm:$0xf0]  ;;  %v1103_v19 = vld [vmem:[#allocation5 + $0x100] sm:$0xf]  ;;  %v1176_v21 = vor.u32 %v1418_v13, %v1175_v12  ;;  %v976_v32 = vor.u32 %v1368_v18, %v975_v17 }
  0x27   :  { %723 = vmatpush.bf16.msra.mxu2 %v1128_v57  ;;  %v1400_v22 = vld [vmem:[#allocation5 + $0x104] sm:$0xf0]  ;;  %v1167_v23 = vld [vmem:[#allocation5 + $0x180] sm:$0xf]  ;;  %v1048_v25 = vor.u32 %v1386_v15, %v1047_v14  ;;  %v1287_v26 = vld [vmem:[#allocation5 + $0x270] sm:$0xf] }
  0x28   :  { %736 = vmatpush.bf16.msra.mxu3 %v1192_v58  ;;  %v1416_v24 = vld [vmem:[#allocation5 + $0x184] sm:$0xf0]  ;;  %v1446_v27 = vld [vmem:[#allocation5 + $0x274] sm:$0xf0]  ;;  %v1381_v28 = vld [vmem:[#allocation5 + $0x74] sm:$0xf]  ;;  %v1104_v36 = vor.u32 %v1400_v22, %v1103_v19 }
  0x29   :  { %710 = vmatpush.bf16.msra.mxu1 %v1064_v62  ;;  %v1033_v29 = vld [vmem:[#allocation5 + $0x78] sm:$0xf0]  ;;  %v1039_v30 = vld [vmem:[#allocation5 + $0x80] sm:$0xf]  ;;  %v1384_v31 = vld [vmem:[#allocation5 + $0x84] sm:$0xf0]  ;;  %v1168_v37 = vor.u32 %v1416_v24, %v1167_v23  ;;  %v1288_v41 = vor.u32 %v1446_v27, %v1287_v26 }
  0x2a   :  { %698 = vmatpush.bf16.msra.mxu0 %v992_v4  ;;  %v83_v33 = vld [vmem:[#allocation2 + $0x10] sm:$0xff]  ;;  %v1359_v34 = vld [vmem:[#allocation5 + $0x300] sm:$0xf]  ;;  %v1464_v35 = vld [vmem:[#allocation5 + $0x304] sm:$0xf0]  ;;  %v1036_v42 = vor.u32 %v1381_v28, %v1033_v29  ;;  %v1040_v46 = vor.u32 %v1384_v31, %v1039_v30  ;;  %vm689_vm0 = vcmask 130048  }
  0x2b   :  { %724 = vmatpush.bf16.msra.mxu2 %v1120_v5  ;;  %v1351_v38 = vld [vmem:[#allocation5 + $0x2f0] sm:$0xf]  ;;  %v1462_v39 = vld [vmem:[#allocation5 + $0x2f4] sm:$0xf0]  ;;  %v1397_v40 = vld [vmem:[#allocation5 + $0xf4] sm:$0xf]  ;;  %v1360_v47 = vor.u32 %v1464_v35, %v1359_v34  ;;  %v1650_v51 = vpack.c.bf16 %v83_v33, %v83_v33 }
  0x2c   :  { %737 = vmatpush.bf16.msra.mxu3 %v1184_v6  ;;  %v1097_v43 = vld [vmem:[#allocation5 + $0xf8] sm:$0xf0]  ;;  %v1279_v44 = vld [vmem:[#allocation5 + $0x260] sm:$0xf]  ;;  %v81_v45 = vld [vmem:[#allocation2] sm:$0xff]  ;;  %v1352_v52 = vor.u32 %v1462_v39, %v1351_v38  ;;  %s1607_s13 = smov [#allocation10]  }
  0x2d   :  { %711 = vmatpush.bf16.msra.mxu1 %v1056_v10  ;;  %v1444_v48 = vld [vmem:[#allocation5 + $0x264] sm:$0xf0]  ;;  %v1379_v49 = vld [vmem:[#allocation5 + $0x64] sm:$0xf]  ;;  %v1025_v50 = vld [vmem:[#allocation5 + $0x68] sm:$0xf0]  ;;  %v1100_v55 = vor.u32 %v1397_v40, %v1097_v43  ;;  %v1652_v58 = vpack.c.bf16 %v81_v45, %v81_v45 }
  0x2e   :  { %699 = vmatpush.bf16.msra.mxu0 %v984_v16  ;;  %v84_v53 = vld [vmem:[#allocation2 + $0x18] sm:$0xff]  ;;  %v82_v54 = vld [vmem:[#allocation2 + $0x8] sm:$0xff]  ;;  %v1460_v57 = vld [vmem:[#allocation5 + $0x2e4] sm:$0xf0]  ;;  %v1280_v59 = vor.u32 %v1444_v48, %v1279_v44  ;;  %v1028_v60 = vor.u32 %v1379_v49, %v1025_v50  ;;  %s959_s14 = sshll.u32 %s1607_s13, 4  ;;  %s961_s17 = sshll.u32 %s1691_s5, 4  ;;  %s960_s14 = int_to_ptr.vmem [resolvable:$true] %s959_s14  ;;  %s962_s17 = int_to_ptr.hbm [resolvable:$true] %s961_s17 }
  0x2f   :  { %725 = vmatpush.bf16.msra.mxu2 %v1112_v20  ;;  %v1343_v56 = vld [vmem:[#allocation5 + $0x2e0] sm:$0xf]  ;;  %v1395_v61 = vld [vmem:[#allocation5 + $0xe4] sm:$0xf]  ;;  %v1089_v62 = vld [vmem:[#allocation5 + $0xe8] sm:$0xf0]  ;;  %v1654_v3 = vpack.c.bf16 %v84_v53, %v84_v53  ;;  %v1656_v4 = vpack.c.bf16 %v82_v54, %v82_v54 }
  0x30   :  { %738 = vmatpush.bf16.msra.mxu3 %v1176_v21  ;;  %v1271_v63 = vld [vmem:[#allocation5 + $0x250] sm:$0xf]  ;;  %v1442_v0 = vld [vmem:[#allocation5 + $0x254] sm:$0xf0]  ;;  %v1377_v1 = vld [vmem:[#allocation5 + $0x54] sm:$0xf]  ;;  %v1344_v5 = vor.u32 %v1460_v57, %v1343_v56  ;;  %v1092_v6 = vor.u32 %v1395_v61, %v1089_v62 }
  0x31   :  { %712 = vmatpush.bf16.msra.mxu1 %v1048_v25  ;;  %v1017_v2 = vld [vmem:[#allocation5 + $0x58] sm:$0xf0]  ;;  %v1335_v7 = vld [vmem:[#allocation5 + $0x2d0] sm:$0xf]  ;;  %v1458_v8 = vld [vmem:[#allocation5 + $0x2d4] sm:$0xf0]  ;;  %v1272_v9 = vor.u32 %v1442_v0, %v1271_v63 }
  0x32   :  { %700 = vmatpush.bf16.msra.mxu0 %v976_v32  ;;  %v1020_v10 = vor.u32 %v1377_v1, %v1017_v2  ;;  %v1393_v11 = vld [vmem:[#allocation5 + $0xd4] sm:$0xf]  ;;  %v1081_v12 = vld [vmem:[#allocation5 + $0xd8] sm:$0xf0]  ;;  %v1263_v13 = vld [vmem:[#allocation5 + $0x240] sm:$0xf]  ;;  %v1336_v17 = vor.u32 %v1458_v8, %v1335_v7 }
  0x33   :  { %726 = vmatpush.bf16.msra.mxu2 %v1104_v36  ;;  %v1440_v14 = vld [vmem:[#allocation5 + $0x244] sm:$0xf0]  ;;  %v1375_v15 = vld [vmem:[#allocation5 + $0x44] sm:$0xf]  ;;  %v1009_v16 = vld [vmem:[#allocation5 + $0x48] sm:$0xf0]  ;;  %v1084_v18 = vor.u32 %v1393_v11, %v1081_v12 }
  0x34   :  { %739 = vmatpush.bf16.msra.mxu3 %v1168_v37  ;;  %v1327_v19 = vld [vmem:[#allocation5 + $0x2c0] sm:$0xf]  ;;  %v1456_v20 = vld [vmem:[#allocation5 + $0x2c4] sm:$0xf0]  ;;  %v1264_v21 = vor.u32 %v1440_v14, %v1263_v13  ;;  %v1012_v22 = vor.u32 %v1375_v15, %v1009_v16  ;;  %v1391_v23 = vld [vmem:[#allocation5 + $0xc4] sm:$0xf] }
  0x35   :  { %713 = vmatpush.bf16.msra.mxu1 %v1040_v46  ;;  %701 = vmatmul.bf16.vlgmr.msra.gmra.mxu0 %v1652_v58  ;;  %v1073_v24 = vld [vmem:[#allocation5 + $0xc8] sm:$0xf0]  ;;  %v1255_v25 = vld [vmem:[#allocation5 + $0x230] sm:$0xf]  ;;  %v1438_v26 = vld [vmem:[#allocation5 + $0x234] sm:$0xf0]  ;;  %v1328_v29 = vor.u32 %v1456_v20, %v1327_v19 }
  0x36   :  { %745 = vmatpush.bf16.msrb.mxu0 %v1288_v41  ;;  %727 = vmatmul.bf16.vlgmr.msra.gmra.mxu2 %v1650_v51  ;;  %v1373_v27 = vld [vmem:[#allocation5 + $0x34] sm:$0xf]  ;;  %v1001_v28 = vld [vmem:[#allocation5 + $0x38] sm:$0xf0]  ;;  %v1076_v30 = vor.u32 %v1391_v23, %v1073_v24  ;;  %v1319_v31 = vld [vmem:[#allocation5 + $0x2b0] sm:$0xf]  ;;  %v1256_v34 = vor.u32 %v1438_v26, %v1255_v25 }
  0x37   :  { %778 = vmatpush.bf16.msrb.mxu2 %v1360_v47  ;;  %740 = vmatmul.bf16.vlgmr.msra.gmra.mxu3 %v1654_v3  ;;  %v1454_v32 = vld [vmem:[#allocation5 + $0x2b4] sm:$0xf0]  ;;  %v1004_v35 = vor.u32 %v1373_v27, %v1001_v28  ;;  %v1389_v36 = vld [vmem:[#allocation5 + $0xb4] sm:$0xf]  ;;  %v1065_v37 = vld [vmem:[#allocation5 + $0xb8] sm:$0xf0] }
  0x38   :  { %784 = vmatpush.bf16.msrb.mxu3 %v1036_v42  ;;  %714 = vmatmul.bf16.vlgmr.msra.gmra.mxu1 %v1656_v4  ;;  %v87_v33 = vld [vmem:[#allocation2 + $0x30] sm:$0xff]  ;;  %v1247_v38 = vld [vmem:[#allocation5 + $0x220] sm:$0xf]  ;;  %v1436_v39 = vld [vmem:[#allocation5 + $0x224] sm:$0xf0]  ;;  %v1320_v42 = vor.u32 %v1454_v32, %v1319_v31  ;;  %v1068_v44 = vor.u32 %v1389_v36, %v1065_v37 }
  0x39   :  { %758 = vmatpush.bf16.msrb.mxu1 %v1352_v52  ;;  %v1371_v40 = vld [vmem:[#allocation5 + $0x24] sm:$0xf]  ;;  %v993_v41 = vld [vmem:[#allocation5 + $0x28] sm:$0xf0]  ;;  %v1662_v43 = vpack.c.bf16 %v87_v33, %v87_v33  ;;  %v1311_v45 = vld [vmem:[#allocation5 + $0x2a0] sm:$0xf]  ;;  %v1248_v47 = vor.u32 %v1436_v39, %v1247_v38 }
  0x3a   :  { %746 = vmatpush.bf16.msrb.mxu0 %v1280_v59  ;;  %v1452_v46 = vld [vmem:[#allocation5 + $0x2a4] sm:$0xf0]  ;;  %v996_v48 = vor.u32 %v1371_v40, %v993_v41  ;;  %v1387_v49 = vld [vmem:[#allocation5 + $0xa4] sm:$0xf]  ;;  %v1057_v50 = vld [vmem:[#allocation5 + $0xa8] sm:$0xf0] }
  0x3b   :  { %797 = vmatpush.bf16.msra.mxu2 %v1100_v55  ;;  %v1239_v52 = vld [vmem:[#allocation5 + $0x210] sm:$0xf]  ;;  %v1434_v53 = vld [vmem:[#allocation5 + $0x214] sm:$0xf0]  ;;  %v1369_v54 = vld [vmem:[#allocation5 + $0x14] sm:$0xf]  ;;  %v1312_v56 = vor.u32 %v1452_v46, %v1311_v45  ;;  %v1060_v57 = vor.u32 %v1387_v49, %v1057_v50 }
  0x3c   :  { %785 = vmatpush.bf16.msrb.mxu3 %v1028_v60  ;;  %v985_v55 = vld [vmem:[#allocation5 + $0x18] sm:$0xf0]  ;;  %v1303_v59 = vld [vmem:[#allocation5 + $0x290] sm:$0xf]  ;;  %v1450_v60 = vld [vmem:[#allocation5 + $0x294] sm:$0xf0]  ;;  %v1240_v62 = vor.u32 %v1434_v53, %v1239_v52 }
  0x3d   :  { %759 = vmatpush.bf16.msrb.mxu1 %v1344_v5  ;;  %v1385_v61 = vld [vmem:[#allocation5 + $0x94] sm:$0xf]  ;;  %v988_v63 = vor.u32 %v1369_v54, %v985_v55  ;;  %v1049_v0 = vld [vmem:[#allocation5 + $0x98] sm:$0xf0]  ;;  %v1231_v1 = vld [vmem:[#allocation5 + $0x200] sm:$0xf]  ;;  %v1304_v8 = vor.u32 %v1450_v60, %v1303_v59 }
  0x3e   :  { %747 = vmatpush.bf16.msrb.mxu0 %v1272_v9  ;;  %v1432_v2 = vld [vmem:[#allocation5 + $0x204] sm:$0xf0]  ;;  %v1367_v5 = vld [vmem:[#allocation5 + $0x4] sm:$0xf]  ;;  %v1413_v7 = vld [vmem:[#allocation5 + $0x174] sm:$0xf]  ;;  %v1052_v12 = vor.u32 %v1385_v61, %v1049_v0 }
  0x3f   :  { %798 = vmatpush.bf16.msra.mxu2 %v1092_v6  ;;  %v977_v6 = vld [vmem:[#allocation5 + $0x8] sm:$0xf0]  ;;  %v1161_v9 = vld [vmem:[#allocation5 + $0x178] sm:$0xf0]  ;;  %v1295_v13 = vld [vmem:[#allocation5 + $0x280] sm:$0xf]  ;;  %v1232_v16 = vor.u32 %v1432_v2, %v1231_v1 }
  0x40   :  { %786 = vmatpush.bf16.msrb.mxu3 %v1020_v10  ;;  %v1445_v10 = vld [vmem:[#allocation5 + $0x274] sm:$0xf]  ;;  %v1289_v11 = vld [vmem:[#allocation5 + $0x278] sm:$0xf0]  ;;  %v1448_v14 = vld [vmem:[#allocation5 + $0x284] sm:$0xf0] }
  0x41   :  { %760 = vmatpush.bf16.msrb.mxu1 %v1336_v17  ;;  %v85_v15 = vld [vmem:[#allocation2 + $0x20] sm:$0xff]  ;;  %v980_v17 = vor.u32 %v1367_v5, %v977_v6  ;;  %v1429_v20 = vld [vmem:[#allocation5 + $0x1f4] sm:$0xf]  ;;  %v1225_v23 = vld [vmem:[#allocation5 + $0x1f8] sm:$0xf0]  ;;  %v1296_v26 = vor.u32 %v1448_v14, %v1295_v13 }
  0x42   :  { %748 = vmatpush.bf16.msrb.mxu0 %v1264_v21  ;;  %v1041_v19 = vld [vmem:[#allocation5 + $0x88] sm:$0xf0]  ;;  %v1164_v21 = vor.u32 %v1413_v7, %v1161_v9  ;;  %v1461_v24 = vld [vmem:[#allocation5 + $0x2f4] sm:$0xf]  ;;  %v1353_v25 = vld [vmem:[#allocation5 + $0x2f8] sm:$0xf0] }
  0x43   :  { %799 = vmatpush.bf16.msra.mxu2 %v1084_v18  ;;  %v1383_v18 = vld [vmem:[#allocation5 + $0x84] sm:$0xf]  ;;  %v86_v27 = vld [vmem:[#allocation2 + $0x28] sm:$0xff]  ;;  %v1281_v33 = vld [vmem:[#allocation5 + $0x268] sm:$0xf0] }
  0x44   :  { %787 = vmatpush.bf16.msrb.mxu3 %v1012_v22  ;;  %v1292_v22 = vor.u32 %v1445_v10, %v1289_v11  ;;  %v1411_v28 = vld [vmem:[#allocation5 + $0x164] sm:$0xf]  ;;  %v1044_v31 = vor.u32 %v1383_v18, %v1041_v19  ;;  %v1668_v37 = vpack.c.bf16 %v86_v27, %v86_v27  ;;  %v1217_v39 = vld [vmem:[#allocation5 + $0x1e8] sm:$0xf0]  ;;  %v1145_v45 = vld [vmem:[#allocation5 + $0x158] sm:$0xf0] }
  0x45   :  { %761 = vmatpush.bf16.msrb.mxu1 %v1328_v29  ;;  %v1153_v29 = vld [vmem:[#allocation5 + $0x168] sm:$0xf0]  ;;  %v1443_v32 = vld [vmem:[#allocation5 + $0x264] sm:$0xf]  ;;  %v1441_v46 = vld [vmem:[#allocation5 + $0x254] sm:$0xf] }
  0x46   :  { %749 = vmatpush.bf16.msrb.mxu0 %v1256_v34  ;;  %1365 = vmatmul.msk.bf16.vlgmr.msrb.gmra.mxu2 %vm689_vm0, %v1662_v43  ;;  %v1228_v34 = vor.u32 %v1429_v20, %v1225_v23  ;;  %v1427_v36 = vld [vmem:[#allocation5 + $0x1e4] sm:$0xf]  ;;  %v1156_v38 = vor.u32 %v1411_v28, %v1153_v29  ;;  %v1345_v41 = vld [vmem:[#allocation5 + $0x2e8] sm:$0xf0]  ;;  %v1425_v50 = vld [vmem:[#allocation5 + $0x1d4] sm:$0xf] }
  0x47   :  { %800 = vmatpush.bf16.msra.mxu2 %v1076_v30  ;;  %v1666_v30 = vpack.c.bf16 %v85_v15, %v85_v15  ;;  %v1459_v40 = vld [vmem:[#allocation5 + $0x2e4] sm:$0xf]  ;;  %v1209_v53 = vld [vmem:[#allocation5 + $0x1d8] sm:$0xf0]  ;;  %v1457_v54 = vld [vmem:[#allocation5 + $0x2d4] sm:$0xf] }
  0x48   :  { %788 = vmatpush.bf16.msrb.mxu3 %v1004_v35  ;;  %v1356_v35 = vor.u32 %v1461_v24, %v1353_v25  ;;  %v1348_v49 = vor.u32 %v1459_v40, %v1345_v41  ;;  %v1337_v55 = vld [vmem:[#allocation5 + $0x2d8] sm:$0xf0]  ;;  %v1137_v59 = vld [vmem:[#allocation5 + $0x148] sm:$0xf0]  ;;  %v1439_v60 = vld [vmem:[#allocation5 + $0x244] sm:$0xf] }
  0x49   :  { %762 = vmatpush.bf16.msrb.mxu1 %v1320_v42  ;;  %v1284_v42 = vor.u32 %v1443_v32, %v1281_v33  ;;  %v1265_v61 = vld [vmem:[#allocation5 + $0x248] sm:$0xf0]  ;;  %v1423_v0 = vld [vmem:[#allocation5 + $0x1c4] sm:$0xf]  ;;  %v1129_v9 = vld [vmem:[#allocation5 + $0x138] sm:$0xf0] }
  0x4a   :  { %750 = vmatpush.bf16.msrb.mxu0 %v1248_v47  ;;  %v1273_v47 = vld [vmem:[#allocation5 + $0x258] sm:$0xf0]  ;;  %v1201_v2 = vld [vmem:[#allocation5 + $0x1c8] sm:$0xf0]  ;;  %v1455_v5 = vld [vmem:[#allocation5 + $0x2c4] sm:$0xf]  ;;  %v1268_v7 = vor.u32 %v1439_v60, %v1265_v61 }
  0x4b   :  { %801 = vmatpush.bf16.msra.mxu2 %v1068_v44  ;;  %v1409_v44 = vld [vmem:[#allocation5 + $0x154] sm:$0xf]  ;;  %v1329_v6 = vld [vmem:[#allocation5 + $0x2c8] sm:$0xf0]  ;;  %v1204_v11 = vor.u32 %v1423_v0, %v1201_v2  ;;  %v1193_v14 = vld [vmem:[#allocation5 + $0x1b8] sm:$0xf0] }
  0x4c   :  { %789 = vmatpush.bf16.msrb.mxu3 %v996_v48  ;;  %v1220_v48 = vor.u32 %v1427_v36, %v1217_v39  ;;  %v1148_v52 = vor.u32 %v1409_v44, %v1145_v45  ;;  %v1437_v10 = vld [vmem:[#allocation5 + $0x234] sm:$0xf]  ;;  %v1403_v18 = vld [vmem:[#allocation5 + $0x124] sm:$0xf]  ;;  %v1121_v19 = vld [vmem:[#allocation5 + $0x128] sm:$0xf0] }
  0x4d   :  { %763 = vmatpush.bf16.msrb.mxu1 %v1312_v56  ;;  %v1276_v56 = vor.u32 %v1441_v46, %v1273_v47  ;;  %v1453_v15 = vld [vmem:[#allocation5 + $0x2b4] sm:$0xf]  ;;  %v1435_v20 = vld [vmem:[#allocation5 + $0x224] sm:$0xf]  ;;  %v1124_v25 = vor.u32 %v1403_v18, %v1121_v19  ;;  %v1313_v28 = vld [vmem:[#allocation5 + $0x2a8] sm:$0xf0] }
  0x4e   :  { %751 = vmatpush.bf16.msrb.mxu0 %v1240_v62  ;;  %v1212_v62 = vor.u32 %v1425_v50, %v1209_v53  ;;  %v1419_v24 = vld [vmem:[#allocation5 + $0x1a4] sm:$0xf]  ;;  %v1113_v32 = vld [vmem:[#allocation5 + $0x118] sm:$0xf0]  ;;  %v1433_v33 = vld [vmem:[#allocation5 + $0x214] sm:$0xf] }
  0x4f   :  { %802 = vmatpush.bf16.msra.mxu2 %v1060_v57  ;;  %v1407_v57 = vld [vmem:[#allocation5 + $0x144] sm:$0xf]  ;;  %v1177_v40 = vld [vmem:[#allocation5 + $0x198] sm:$0xf0]  ;;  %v1449_v41 = vld [vmem:[#allocation5 + $0x294] sm:$0xf] }
  0x50   :  { %790 = vmatpush.bf16.msrb.mxu3 %v988_v63  ;;  %v1340_v63 = vor.u32 %v1457_v54, %v1337_v55  ;;  %v1140_v1 = vor.u32 %v1407_v57, %v1137_v59  ;;  %v1451_v27 = vld [vmem:[#allocation5 + $0x2a4] sm:$0xf]  ;;  %v1105_v46 = vld [vmem:[#allocation5 + $0x108] sm:$0xf0]  ;;  %v890_v2 = vld [vmem:[#allocation8 + $0x68] sm:$0xff] }
  0x51   :  { %764 = vmatpush.bf16.msrb.mxu1 %v1304_v8  ;;  %v1405_v8 = vld [vmem:[#allocation5 + $0x134] sm:$0xf]  ;;  %v1316_v36 = vor.u32 %v1451_v27, %v1313_v28  ;;  %v1399_v45 = vld [vmem:[#allocation5 + $0x104] sm:$0xf]  ;;  %v1361_v50 = vld [vmem:[#allocation5 + $0x308] sm:$0xf0] }
  0x52   :  { %752 = vmatpush.bf16.msrb.mxu0 %v1232_v16  ;;  %v1132_v13 = vor.u32 %v1405_v8, %v1129_v9  ;;  %v1321_v16 = vld [vmem:[#allocation5 + $0x2b8] sm:$0xf0]  ;;  %v1431_v47 = vld [vmem:[#allocation5 + $0x204] sm:$0xf]  ;;  %v1108_v54 = vor.u32 %v1399_v45, %v1105_v46  ;;  %v1297_v60 = vld [vmem:[#allocation5 + $0x288] sm:$0xf0] }
  0x53   :  { %803 = vmatpush.bf16.msra.mxu2 %v1052_v12  ;;  %v1421_v12 = vld [vmem:[#allocation5 + $0x1b4] sm:$0xf]  ;;  %v1324_v23 = vor.u32 %v1453_v15, %v1321_v16  ;;  %v1415_v55 = vld [vmem:[#allocation5 + $0x184] sm:$0xf]  ;;  %v892_v0 = vld [vmem:[#allocation8 + $0x78] sm:$0xff] }
  0x54   :  { %791 = vmatpush.bf16.msrb.mxu3 %v980_v17  ;;  %v1447_v59 = vld [vmem:[#allocation5 + $0x284] sm:$0xf]  ;;  %v881_v8 = vld [vmem:[#allocation8 + $0x20] sm:$0xff]  ;;  %v880_v9 = vld [vmem:[#allocation8 + $0x18] sm:$0xff] }
  0x55   :  { %765 = vmatpush.bf16.msrb.mxu1 %v1296_v26  ;;  %753 = vmatmul.bf16.vlgmr.msrb.gmra.mxu0 %v1666_v30  ;;  %v1185_v26 = vld [vmem:[#allocation5 + $0x1a8] sm:$0xf0]  ;;  %v907_v18 = vld [vmem:[#allocation8 + $0xf0] sm:$0xff]  ;;  %v898_v46 = vld [vmem:[#allocation8 + $0xa8] sm:$0xff] }
  0x56   :  { %810 = vmatpush.bf16.msra.mxu0 %v1164_v21  ;;  %v1249_v21 = vld [vmem:[#allocation5 + $0x228] sm:$0xf0] }
  0x57   :  { %804 = vmatpush.bf16.msra.mxu2 %v1044_v31  ;;  %792 = vmatmul.bf16.vlgmr.msrb.gmra.mxu3 %v1652_v58  ;;  %v1332_v58 = vor.u32 %v1455_v5, %v1329_v6  ;;  %v1252_v29 = vor.u32 %v1435_v20, %v1249_v21  ;;  %v1401_v31 = vld [vmem:[#allocation5 + $0x114] sm:$0xf]  ;;  %v888_v6 = vld [vmem:[#allocation8 + $0x58] sm:$0xff]  ;;  %v906_v21 = vld [vmem:[#allocation8 + $0xe8] sm:$0xff] }
  0x58   :  { %836 = vmatpush.bf16.msra.mxu3 %v1292_v22  ;;  %766 = vmatmul.bf16.vlgmr.msrb.gmra.mxu1 %v1668_v37  ;;  %v1196_v22 = vor.u32 %v1421_v12, %v1193_v14  ;;  %v1116_v39 = vor.u32 %v1401_v31, %v1113_v32  ;;  %v889_v5 = vld [vmem:[#allocation8 + $0x60] sm:$0xff]  ;;  %v193_v14 = vld [vmem:[#allocation7] sm:$0x3]  ;;  %v903_v31 = vld [vmem:[#allocation8 + $0xd0] sm:$0xff] }
  0x59   :  { %823 = vmatpush.bf16.msra.mxu1 %v1228_v34  ;;  %v1241_v34 = vld [vmem:[#allocation5 + $0x218] sm:$0xf0]  ;;  %v877_v12 = vld [vmem:[#allocation8] sm:$0xff]  ;;  %v195_v20 = vperm.slane %v193_v14, 0 }
  0x5a   :  { %811 = vmatpush.bf16.msra.mxu0 %v1156_v38  ;;  %805 = vmatmul.bf16.vlgmr.msra.gmra.mxu2 %v1656_v4  ;;  %v1257_v4 = vld [vmem:[#allocation5 + $0x238] sm:$0xf0]  ;;  %v1417_v38 = vld [vmem:[#allocation5 + $0x194] sm:$0xf]  ;;  %v1244_v44 = vor.u32 %v1433_v33, %v1241_v34 }
  0x5b   :  { %849 = vmatpush.bf16.msrb.mxu2 %v1356_v35  ;;  %v1260_v17 = vor.u32 %v1437_v10, %v1257_v4  ;;  %v1188_v35 = vor.u32 %v1419_v24, %v1185_v26  ;;  %v879_v4 = vld [vmem:[#allocation8 + $0x10] sm:$0xff]  ;;  %v902_v33 = vld [vmem:[#allocation8 + $0xc8] sm:$0xff] }
  0x5c   :  { %837 = vmatpush.bf16.msra.mxu3 %v1284_v42  ;;  %v1305_v42 = vld [vmem:[#allocation5 + $0x298] sm:$0xf0] }
  0x5d   :  { %824 = vmatpush.bf16.msra.mxu1 %v1220_v48  ;;  %v1233_v48 = vld [vmem:[#allocation5 + $0x208] sm:$0xf0]  ;;  %v1308_v53 = vor.u32 %v1449_v41, %v1305_v42 }
  0x5e   :  { %812 = vmatpush.bf16.msra.mxu0 %v1148_v52  ;;  %v1180_v52 = vor.u32 %v1417_v38, %v1177_v40  ;;  %v1236_v57 = vor.u32 %v1431_v47, %v1233_v48  ;;  %v901_v38 = vld [vmem:[#allocation8 + $0xc0] sm:$0xff]  ;;  %v900_v41 = vld [vmem:[#allocation8 + $0xb8] sm:$0xff] }
  0x5f   :  { %850 = vmatpush.bf16.msrb.mxu2 %v1348_v49  ;;  %v1463_v49 = vld [vmem:[#allocation5 + $0x304] sm:$0xf]  ;;  %v897_v48 = vld [vmem:[#allocation8 + $0xa0] sm:$0xff] }
  0x60   :  { %838 = vmatpush.bf16.msra.mxu3 %v1276_v56  ;;  %v1169_v56 = vld [vmem:[#allocation5 + $0x188] sm:$0xf0]  ;;  %v1364_v61 = vor.u32 %v1463_v49, %v1361_v50 }
  0x61   :  { %825 = vmatpush.bf16.msra.mxu1 %v1212_v62  ;;  %v1172_v62 = vor.u32 %v1415_v55, %v1169_v56  ;;  %v894_v55 = vld [vmem:[#allocation8 + $0x88] sm:$0xff]  ;;  %v893_v56 = vld [vmem:[#allocation8 + $0x80] sm:$0xff] }
  0x62   :  { %813 = vmatpush.bf16.msra.mxu0 %v1140_v1  ;;  %v891_v1 = vld [vmem:[#allocation8 + $0x70] sm:$0xff] }
  0x63   :  { %851 = vmatpush.bf16.msrb.mxu2 %v1340_v63  ;;  %v1300_v63 = vor.u32 %v1447_v59, %v1297_v60  ;;  %v196_v60 = vperm.slane %v193_v14, 1 }
  0x64   :  { %839 = vmatpush.bf16.msra.mxu3 %v1268_v7  ;;  %v885_v7 = vld [vmem:[#allocation8 + $0x40] sm:$0xff] }
  0x65   :  { %826 = vmatpush.bf16.msra.mxu1 %v1204_v11 }
  0x66   :  { %814 = vmatpush.bf16.msra.mxu0 %v1132_v13 }
  0x67   :  { %852 = vmatpush.bf16.msrb.mxu2 %v1332_v58  ;;  %v878_v58 = vld [vmem:[#allocation8 + $0x8] sm:$0xff] }
  0x68   :  { %840 = vmatpush.bf16.msra.mxu3 %v1260_v17  ;;  %v908_v17 = vld [vmem:[#allocation8 + $0xf8] sm:$0xff] }
  0x69   :  { %827 = vmatpush.bf16.msra.mxu1 %v1196_v22 }
  0x6a   :  { %815 = vmatpush.bf16.msra.mxu0 %v1124_v25  ;;  %v904_v25 = vld [vmem:[#allocation8 + $0xd8] sm:$0xff] }
  0x6b   :  { %853 = vmatpush.bf16.msrb.mxu2 %v1324_v23  ;;  %v905_v23 = vld [vmem:[#allocation8 + $0xe0] sm:$0xff] }
  0x6c   :  { %841 = vmatpush.bf16.msra.mxu3 %v1252_v29 }
  0x6d   :  { %828 = vmatpush.bf16.msra.mxu1 %v1188_v35 }
  0x6e   :  { %816 = vmatpush.bf16.msra.mxu0 %v1116_v39 }
  0x6f   :  { %854 = vmatpush.bf16.msrb.mxu2 %v1316_v36 }
  0x70   :  { %842 = vmatpush.bf16.msra.mxu3 %v1244_v44  ;;  %v899_v44 = vld [vmem:[#allocation8 + $0xb0] sm:$0xff] }
  0x71   :  { %829 = vmatpush.bf16.msra.mxu1 %v1180_v52 }
  0x72   :  { %817 = vmatpush.bf16.msra.mxu0 %v1108_v54  ;;  %v895_v54 = vld [vmem:[#allocation8 + $0x90] sm:$0xff] }
  0x73   :  { %855 = vmatpush.bf16.msrb.mxu2 %v1308_v53  ;;  %v896_v53 = vld [vmem:[#allocation8 + $0x98] sm:$0xff] }
  0x74   :  { %843 = vmatpush.bf16.msra.mxu3 %v1236_v57 }
  0x75   :  { %830 = vmatpush.bf16.msra.mxu1 %v1172_v62  ;;  %818 = vmatmul.bf16.vlgmr.msra.gmra.mxu0 %v1650_v51  ;;  %v887_v51 = vld [vmem:[#allocation8 + $0x50] sm:$0xff] }
  0x76   :  { %869 = vmatpush.bf16.msrb.mxu0 %v1364_v61 }
  0x77   :  { %844 = vmatmul.bf16.vlgmr.msra.gmra.mxu3 %v1666_v30  ;;  %856 = vmatpush.bf16.msrb.mxu2 %v1300_v63  ;;  %v886_v30 = vld [vmem:[#allocation8 + $0x48] sm:$0xff] }
  0x78   :  { %831 = vmatmul.bf16.vlgmr.msra.gmra.mxu1 %v1654_v3  ;;  %v884_v3 = vld [vmem:[#allocation8 + $0x38] sm:$0xff]  ;;  %933 = vmatpush.msrb.mxu3 %v908_v17 }
  0x79   :  { %913 = vmatpush.msrb.mxu1 %v892_v0 }
  0x7a   :  { %857 = vmatmul.bf16.vlgmr.msrb.gmra.mxu2 %v1668_v37  ;;  %v883_v37 = vld [vmem:[#allocation8 + $0x30] sm:$0xff]  ;;  %934 = vmatpush.msrb.mxu3 %v907_v18 }
  0x7b   :  { %914 = vmatpush.msrb.mxu1 %v891_v1 }
  0x7c   :  { %935 = vmatpush.msrb.mxu3 %v906_v21 }
  0x7d   :  { %915 = vmatpush.msrb.mxu1 %v890_v2 }
  0x7e   :  { %936 = vmatpush.msrb.mxu3 %v905_v23 }
  0x7f   :  { %916 = vmatpush.msrb.mxu1 %v889_v5 }
  0x80   :  { %937 = vmatpush.msrb.mxu3 %v904_v25 }
  0x81   :  { %917 = vmatpush.msrb.mxu1 %v888_v6 }
  0x82   :  { %938 = vmatpush.msrb.mxu3 %v903_v31 }
  0x83   :  { %918 = vmatpush.msrb.mxu1 %v887_v51 }
  0x84   :  { %939 = vmatpush.msrb.mxu3 %v902_v33 }
  0x85   :  { %1366 = vmatmul.msk.bf16.vlgmr.msrb.gmra.mxu0 %vm689_vm0, %v1662_v43  ;;  %919 = vmatpush.msrb.mxu1 %v886_v30  ;;  %v882_v43 = vld [vmem:[#allocation8 + $0x28] sm:$0xff] }
  0x86   :  { %940 = vmatpush.msrb.mxu3 %v901_v38 }
  0x87   :  { %920 = vmatpush.msrb.mxu1 %v885_v7 }
  0x88   :  { %941 = vmatpush.msrb.mxu3 %v900_v41 }
  0x89   :  { %921 = vmatpush.msrb.mxu1 %v884_v3 }
  0x8a   :  { %942 = vmatpush.msrb.mxu3 %v899_v44 }
  0x8b   :  { %922 = vmatpush.msrb.mxu1 %v883_v37 }
  0x8c   :  { %943 = vmatpush.msrb.mxu3 %v898_v46 }
  0x8d   :  { %923 = vmatpush.msrb.mxu1 %v882_v43 }
  0x8e   :  { %944 = vmatpush.msrb.mxu3 %v897_v48 }
  0x8f   :  { %924 = vmatpush.msrb.mxu1 %v881_v8 }
  0x90   :  { %945 = vmatpush.msrb.mxu3 %v896_v53 }
  0x91   :  { %925 = vmatpush.msrb.mxu1 %v880_v9 }
  0x92   :  { %946 = vmatpush.msrb.mxu3 %v895_v54 }
  0x93   :  { %926 = vmatpush.msrb.mxu1 %v879_v4 }
  0x94   :  { %947 = vmatpush.msrb.mxu3 %v894_v55 }
  0x95   :  { %927 = vmatpush.msrb.mxu1 %v878_v58 }
  0x96   :  { %948 = vmatpush.msrb.mxu3 %v893_v56 }
  0x97   :  { %928 = vmatpush.msrb.mxu1 %v877_v12 }
  0xb2   :  { %v702_v10 = vpop.f32.mrf.mxu0 }
  0xb3   :  { %v703_v24 = vadd.f32 %v702_v10, %v195_v20 }
  0xb5   :  { %v715_v11 = vpop.f32.mrf.mxu1 }
  0xb6   :  { %v716_v27 = vadd.f32 %v715_v11, %v703_v24  ;;  %v1472_v11 = vld [vmem:[%s1690_s4] ss:$0 sm:$0xff] }
  0xb9   :  { %v728_v13 = vpop.f32.mrf.mxu2 }
  0xba   :  { %v741_v15 = vpop.f32.mrf.mxu3  ;;  %v704_v16 = vpop.f32.mrf.mxu0  ;;  %v729_v29 = vadd.f32 %v728_v13, %v716_v27 }
  0xbc   :  { %v742_v32 = vadd.f32 %v741_v15, %v729_v29 }
  0xbd   :  { %v717_v19 = vpop.f32.mrf.mxu1 }
  0xc1   :  { %v730_v22 = vpop.f32.mrf.mxu2 }
  0xc2   :  { %v743_v26 = vpop.f32.mrf.mxu3 }
  0xc9   :  { %v780_v28 = vpop.f32.mrf.mxu2 }
  0xd1   :  { %v782_v36 = vpop.f32.mrf.mxu2 }
  0xd2   :  { %v754_v34 = vpop.f32.mrf.mxu0 }
  0xd3   :  { %v755_v35 = vadd.f32 %v754_v34, %v742_v32 }
  0xd5   :  { %v767_v39 = vpop.f32.mrf.mxu1 }
  0xd6   :  { %v768_v40 = vadd.f32 %v767_v39, %v755_v35 }
  0xd8   :  { %v781_v42 = vadd.f32 %v780_v28, %v768_v40 }
  0xda   :  { %v875_v45 = vmax.f32 %v781_v42, 0.0  ;;  %v756_v47 = vpop.f32.mrf.mxu0  ;;  %v793_v50 = vpop.f32.mrf.mxu3 }
  0xdb   :  { %v794_v61 = vadd.f32 %v793_v50, %v196_v60 }
  0xdc   :  { %929 = vmatmul.f32.vlgmr.msrb.gmra.mxu1 %v875_v45 }
  0xdd   :  { %v806_v49 = vpop.f32.mrf.mxu2  ;;  %v769_v52 = vpop.f32.mrf.mxu1 }
  0xde   :  { %v807_v63 = vadd.f32 %v806_v49, %v794_v61 }
  0xe2   :  { %v795_v59 = vpop.f32.mrf.mxu3 }
  0xe5   :  { %v808_v57 = vpop.f32.mrf.mxu2 }
  0xf2   :  { %v819_v62 = vpop.f32.mrf.mxu0 }
  0xf3   :  { %v820_v1 = vadd.f32 %v819_v62, %v807_v63 }
  0xf5   :  { %v832_v0 = vpop.f32.mrf.mxu1 }
  0xf6   :  { %v833_v6 = vadd.f32 %v832_v0, %v820_v1 }
  0xfa   :  { %v845_v2 = vpop.f32.mrf.mxu3  ;;  %v821_v5 = vpop.f32.mrf.mxu0 }
  0xfb   :  { %v846_v30 = vadd.f32 %v845_v2, %v833_v6 }
  0xfd   :  { %v858_v51 = vpop.f32.mrf.mxu2  ;;  %v834_v7 = vpop.f32.mrf.mxu1 }
  0xfe   :  { %v859_v3 = vadd.f32 %v858_v51, %v846_v30 }
 0x102   :  { %v847_v37 = vpop.f32.mrf.mxu3  ;;  %v871_v43 = vpop.f32.mrf.mxu0 }
 0x103   :  { %v872_v8 = vadd.f32 %v871_v43, %v859_v3 }
 0x105   :  { %v860_v9 = vpop.f32.mrf.mxu2  ;;  %v876_v10 = vmax.f32 %v872_v8, 0.0 }
 0x107   :  { %949 = vmatmul.f32.vlgmr.msrb.gmra.mxu3 %v876_v10 }
 0x10a   :  { %v873_v4 = vpop.f32.mrf.mxu0 }
 0x159   :  { %v930_v58 = vpop.f32.mrf.mxu1 }
 0x15a   :  { %v931_v12 = vadd.f32 %v1472_v11, %v930_v58 }
 0x18a   :  { %v950_v13 = vpop.f32.mrf.mxu3 }
 0x18b   :  { %v951_v14 = vadd.f32 %v950_v13, %v931_v12 }
 0x18d   :  { %953 = vst [vmem:[#allocation10] sm:$0xff] %v951_v14 }
 0x18e   :  { %964 = dma.vmem_to_hbm [thread:$0]  %s960_s14, 128, %s962_s17, [#allocation4]  }
 0x18f   :  { %1599 = dma.done.wait [#allocation4], 128  }
 0x190   :  { %1600 = vsyncadd [#allocation4], 4294967168 }
 0x191   :  { %969 = vsyncpa [#allocation3], 1 }
 0x192   :  { %970 = vsyncpa [#allocation6], 1 }
 0x193   :  { %971 = vsyncpa [#allocation9], 1 }
 0x194   :  { %972 = vsyncpa [#allocation4], 1 }

</bundles_post_ra>
